<compile_context>
chip_gen: v7x
topology: tpu7x:2x2x1
jax: 0.10.0
libtpu: 0.0.40
codegen_flags: <defaults>
</compile_context>

<pallas_src>
import functools
import math

import jax
import jax.numpy as jnp
from jax.experimental import pallas as pl
from jax.experimental.pallas import tpu as pltpu


# ----------------------------------------------------------------------------
# Pallas kernels
# ----------------------------------------------------------------------------
def _minibatch_std_kernel(x_ref, o_ref):
    """MiniBatchStdDev statistic: mean over positions of per-position std over batch.

    x_ref: (N, H, W*C) f32 VMEM
    o_ref: (1, 1) f32 VMEM
    """
    x = x_ref[...]
    mu = jnp.mean(x, axis=0, keepdims=True)
    var = jnp.mean((x - mu) ** 2, axis=0)          # biased variance
    std = jnp.sqrt(var + 1e-8)
    o_ref[...] = jnp.mean(std).reshape(1, 1)


def _dblock_kernel(std_ref, x_ref, b1_ref, bias1_ref, b2_ref, bias2_ref,
                   o_ref, xpad_ref, hpad_ref, *,
                   H, W, Cr, Cout, mbatch,
                   K1, P1, Wp1, Ho1, Wo1,
                   K2, P2, Ho2):
    """Fused [std-channel] + conv1 + LeakyReLU + conv2 + LeakyReLU for one image.

    std_ref  : (1, 1) f32 SMEM          minibatch-std scalar (unused if not mbatch)
    x_ref    : (1, H, W*Cr) f32         input image, channels-last flattened
    b1_ref   : (K1, L1, Wo1*Cout) bf16  banded conv1 weights (L1 = Wp1*Cr [+ Wp1])
    bias1_ref: (1, Wo1*Cout) f32        conv1 bias tiled along lanes
    b2_ref   : (K2, L2, Wo2*Cout) bf16  banded conv2 weights (L2 = Wp2*Cout)
    bias2_ref: (1, Wo2*Cout) f32
    o_ref    : (1, Ho2, Wo2*Cout) f32   lane-dense output block
    xpad_ref : (Hp1, L1) f32 VMEM       zero-padded conv1 input (+ std map)
    hpad_ref : (Hp2, L2) f32 VMEM       zero-padded conv1 output (stays in VMEM)
    """
    f32 = jnp.float32

    # ---- conv1 input: zero pad + real channels + optional constant std channel ----
    xpad_ref[...] = jnp.zeros(xpad_ref.shape, xpad_ref.dtype)
    xpad_ref[P1:P1 + H, P1 * Cr:(P1 + W) * Cr] = x_ref[0]
    if mbatch:
        std = std_ref[0, 0]
        base = Wp1 * Cr                                   # std-map lanes start here
        xpad_ref[P1:P1 + H, base + P1:base + P1 + W] = jnp.full((H, W), std, f32)

    # ---- conv1: K1 row-tap matmuls (bf16 operands, f32 accumulation) ----
    acc1 = jnp.zeros((Ho1, Wo1 * Cout), f32)
    for ky in range(K1):
        acc1 = acc1 + jnp.dot(
            xpad_ref[ky:ky + Ho1, :].astype(jnp.bfloat16),
            b1_ref[ky],
            preferred_element_type=f32)
    h1 = acc1 + bias1_ref[...]
    h1 = jnp.where(h1 > 0, h1, 0.2 * h1)                  # LeakyReLU(0.2), f32 on VPU

    # ---- conv2 input: pad the VMEM-resident intermediate activation ----
    hpad_ref[...] = jnp.zeros(hpad_ref.shape, hpad_ref.dtype)
    hpad_ref[P2:P2 + Ho1, P2 * Cout:(P2 + Wo1) * Cout] = h1

    # ---- conv2: K2 row-tap matmuls ----
    acc2 = jnp.zeros((Ho2, o_ref.shape[2]), f32)
    for ky in range(K2):
        acc2 = acc2 + jnp.dot(
            hpad_ref[ky:ky + Ho2, :].astype(jnp.bfloat16),
            b2_ref[ky],
            preferred_element_type=f32)
    h2 = acc2 + bias2_ref[...]
    h2 = jnp.where(h2 > 0, h2, 0.2 * h2)

    o_ref[0] = h2.astype(o_ref.dtype)                     # lane-dense (Ho2, Wo2*Cout)


# ----------------------------------------------------------------------------
# Wrappers
# ----------------------------------------------------------------------------
def _minibatch_std(x_flat):
    """x_flat: (N, H, W*C) f32 -> (1, 1) f32 minibatch-std scalar."""
    return pl.pallas_call(
        _minibatch_std_kernel,
        out_shape=jax.ShapeDtypeStruct((1, 1), jnp.float32),
        in_specs=[pl.BlockSpec(memory_space=pltpu.MemorySpace.VMEM)],
        out_specs=pl.BlockSpec(memory_space=pltpu.MemorySpace.VMEM),
    )(x_flat)


def _band_matrix(w_hwio, wp, wo):
    """Banded conv weight for the flattened-lane layout.

    w_hwio: (K, K, Ci, Co) already equal-LR scaled.
    Returns B with shape (K, wp*Ci, wo*Co) such that
      out[ho, wo_*Co+co] = sum_ky  Xpad2d[ho+ky, :] @ B[ky]
    where Xpad2d[h, x*Ci+ci] = xpad[h, x, ci] (zero padded width wp).
    Built once per call in plain XLA (tiny); zeros encode the W-padding band.
    """
    K, _, Ci, Co = w_hwio.shape
    xp = jnp.arange(wp)[:, None]                # padded-width position x'
    wo_idx = jnp.arange(wo)[None, :]            # output position
    kx = xp - wo_idx                            # (wp, wo)
    valid = (kx >= 0) & (kx < K)
    kx_c = jnp.clip(kx, 0, K - 1)
    g = w_hwio[:, kx_c, :, :]                   # (K, wp, wo, Ci, Co)
    g = jnp.where(valid[None, :, :, None, None], g, jnp.zeros_like(g))
    g = jnp.transpose(g, (0, 1, 3, 2, 4))       # (K, wp, Ci, wo, Co)
    return g.reshape(K, wp * Ci, wo * Co)


# ----------------------------------------------------------------------------
# D_ConvBlock module
# ----------------------------------------------------------------------------
class DConvBlockPallas:
    """Mirror of the PyTorch D_ConvBlock with EqualLR conv weights.

    EqualLRConv2d: weight ~ N(0, 1), bias = 0, runtime scale sqrt(2 / fan_in).
    """

    def __init__(self, in_c, out_c, ksize1, padding, ksize2=None, padding2=None,
                 stride=None, mbatch=None, *, key):
        if ksize2 is None:
            ksize2 = ksize1
        if padding2 is None:
            padding2 = padding
        del stride  # present in the PyTorch signature but unused by the layers
        self.mbatch = bool(mbatch)
        self.in_c, self.out_c = in_c, out_c
        self.k1, self.p1 = ksize1, padding
        self.k2, self.p2 = ksize2, padding2

        k1, k2 = jax.random.split(key)
        # PyTorch OIHW weight layout; deterministic synthetic init.
        self.w1 = jax.random.normal(k1, (out_c, in_c, ksize1, ksize1), jnp.float32)
        self.b1 = jnp.zeros((out_c,), jnp.float32)
        self.scale1 = math.sqrt(2.0 / (in_c * ksize1 * ksize1))
        self.w2 = jax.random.normal(k2, (out_c, out_c, ksize2, ksize2), jnp.float32)
        self.b2 = jnp.zeros((out_c,), jnp.float32)
        self.scale2 = math.sqrt(2.0 / (out_c * ksize2 * ksize2))

    def __call__(self, x_nchw):
        N, Cx, H, W = x_nchw.shape
        Cr = self.in_c - (1 if self.mbatch else 0)     # real input channels
        assert Cx == Cr, (Cx, Cr)
        Cout = self.out_c
        K1, P1, K2, P2 = self.k1, self.p1, self.k2, self.p2

        Hp1, Wp1 = H + 2 * P1, W + 2 * P1
        Ho1, Wo1 = Hp1 - K1 + 1, Wp1 - K1 + 1
        Hp2, Wp2 = Ho1 + 2 * P2, Wo1 + 2 * P2
        Ho2, Wo2 = Hp2 - K2 + 1, Wp2 - K2 + 1

        # NCHW -> NHWC, flattened to (N, H, W*C): free row-major reshape.
        x_flat = jnp.transpose(x_nchw, (0, 2, 3, 1)).reshape(N, H, W * Cr)

        if self.mbatch:
            std = _minibatch_std(x_flat)
        else:
            std = jnp.zeros((1, 1), jnp.float32)

        # Banded (tap-fused) weights, bf16 for a single native MXU pass.
        w1 = jnp.transpose(self.w1, (2, 3, 1, 0)) * self.scale1   # OIHW -> HWIO
        b1m = _band_matrix(w1[:, :, :Cr, :], Wp1, Wo1)
        if self.mbatch:
            b1m = jnp.concatenate(
                [b1m, _band_matrix(w1[:, :, Cr:, :], Wp1, Wo1)], axis=1)
        b1m = b1m.astype(jnp.bfloat16)
        bias1 = jnp.tile(self.b1, Wo1).reshape(1, Wo1 * Cout).astype(jnp.float32)

        w2 = jnp.transpose(self.w2, (2, 3, 1, 0)) * self.scale2
        b2m = _band_matrix(w2, Wp2, Wo2).astype(jnp.bfloat16)
        bias2 = jnp.tile(self.b2, Wo2).reshape(1, Wo2 * Cout).astype(jnp.float32)

        L1 = b1m.shape[1]            # Wp1*Cr (+ Wp1 if mbatch)
        L2 = Wp2 * Cout

        kernel = functools.partial(
            _dblock_kernel,
            H=H, W=W, Cr=Cr, Cout=Cout, mbatch=self.mbatch,
            K1=K1, P1=P1, Wp1=Wp1, Ho1=Ho1, Wo1=Wo1,
            K2=K2, P2=P2, Ho2=Ho2)

        out_flat = pl.pallas_call(
            kernel,
            out_shape=jax.ShapeDtypeStruct((N, Ho2, Wo2 * Cout), jnp.float32),
            grid=(N,),
            in_specs=[
                pl.BlockSpec(memory_space=pltpu.MemorySpace.SMEM),          # std scalar
                pl.BlockSpec((1, H, W * Cr), lambda n: (n, 0, 0)),          # x block
                pl.BlockSpec((K1, L1, Wo1 * Cout), lambda n: (0, 0, 0)),    # B1
                pl.BlockSpec((1, Wo1 * Cout), lambda n: (0, 0)),            # bias1
                pl.BlockSpec((K2, L2, Wo2 * Cout), lambda n: (0, 0, 0)),    # B2
                pl.BlockSpec((1, Wo2 * Cout), lambda n: (0, 0)),            # bias2
            ],
            out_specs=pl.BlockSpec((1, Ho2, Wo2 * Cout), lambda n: (n, 0, 0)),
            scratch_shapes=[pltpu.VMEM((Hp1, L1), jnp.float32),
                            pltpu.VMEM((Hp2, L2), jnp.float32)],
            compiler_params=pltpu.CompilerParams(
                dimension_semantics=("parallel",),
                vmem_limit_bytes=32 * 1024 * 1024),
        )(std, x_flat, b1m, bias1, b2m, bias2)

        out = out_flat.reshape(N, Ho2, Wo2, Cout)         # free reshape
        return jnp.transpose(out, (0, 3, 1, 2))           # NHWC -> NCHW


# ----------------------------------------------------------------------------
# Pure-JAX reference (precision-matched: bf16 matmul operands, f32 accumulate)
# ----------------------------------------------------------------------------
def _reference(block, x_nchw):
    x = x_nchw
    if block.mbatch:
        mu = jnp.mean(x, axis=0, keepdims=True)
        var = jnp.mean((x - mu) ** 2, axis=0)
        std = jnp.sqrt(var + 1e-8)
        m = jnp.mean(std)
        feat = jnp.full((x.shape[0], 1, x.shape[2], x.shape[3]), m, x.dtype)
        x = jnp.concatenate([x, feat], axis=1)

    def conv(x, w, b, scale, pad):
        y = jax.lax.conv_general_dilated(
            x.astype(jnp.bfloat16), (w * scale).astype(jnp.bfloat16),
            window_strides=(1, 1), padding=((pad, pad), (pad, pad)),
            dimension_numbers=("NCHW", "OIHW", "NCHW"),
            preferred_element_type=jnp.float32)
        y = y + b.reshape(1, -1, 1, 1)
        return jnp.where(y > 0, y, 0.2 * y)

    x = conv(x, block.w1, block.b1, block.scale1, block.p1)
    x = conv(x, block.w2, block.b2, block.scale2, block.p2)
    return x


if __name__ == "__main__":
    key = jax.random.PRNGKey(0)
    kx, kp = jax.random.split(key)

    # PyTorch-convention NCHW input: batch=2, channels=4, spatial 16x16.
    x = jax.random.normal(kx, (2, 4, 16, 16), jnp.float32)

    # With mbatch=True the first conv sees 4 + 1 channels, so in_c = 5
    # (how the StyleGAN discriminator's final block is configured).
    block = DConvBlockPallas(in_c=5, out_c=8, ksize1=3, padding=1,
                             mbatch=True, key=kp)

    fwd = jax.jit(lambda v: block(v))
    out = jax.block_until_ready(fwd(x))
    assert out.shape == (2, 8, 16, 16), out.shape

    # Tolerance covers bf16-operand rounding / accumulation-order differences only;
    # any structural bug would be O(0.1 - 1).
    ref = _reference(block, x)
    err = float(jnp.max(jnp.abs(out - ref)))
    assert jnp.allclose(out, ref, atol=2e-2, rtol=2e-2), err

    print("KERNEL_OK")
</pallas_src>

<mosaic_0001>
module attributes {stable_mosaic.version = 11 : i64} {
  func.func @_minibatch_std_kernel(%arg0: memref<2x16x64xf32, #tpu.memory_space<vmem>>, %arg1: memref<1x1xf32, #tpu.memory_space<vmem>>) attributes {dimension_semantics = [], scalar_prefetch = 0 : i64, scratch_operands = 0 : i64, tpu.core_type = #tpu.core_type<tc>} {
    %c0 = arith.constant 0 : index
    %c0_0 = arith.constant 0 : index
    %c0_1 = arith.constant 0 : index
    %0 = vector.load %arg0[%c0, %c0_0, %c0_1] : memref<2x16x64xf32, #tpu.memory_space<vmem>>, vector<2x16x64xf32>
    %cst = arith.constant dense<0.000000e+00> : vector<16x64xf32>
    %1 = vector.multi_reduction <add>, %0, %cst [0] : vector<2x16x64xf32> to vector<16x64xf32>
    %2 = vector.shape_cast %1 : vector<16x64xf32> to vector<1x16x64xf32>
    %cst_2 = arith.constant 2.000000e+00 : f32
    %3 = vector.broadcast %cst_2 : f32 to vector<1x16x64xf32>
    %4 = arith.divf %2, %3 : vector<1x16x64xf32>
    %5 = vector.broadcast %4 : vector<1x16x64xf32> to vector<2x16x64xf32>
    %6 = arith.subf %0, %5 : vector<2x16x64xf32>
    %7 = arith.mulf %6, %6 : vector<2x16x64xf32>
    %cst_3 = arith.constant dense<0.000000e+00> : vector<16x64xf32>
    %8 = vector.multi_reduction <add>, %7, %cst_3 [0] : vector<2x16x64xf32> to vector<16x64xf32>
    %cst_4 = arith.constant 2.000000e+00 : f32
    %9 = vector.broadcast %cst_4 : f32 to vector<16x64xf32>
    %10 = arith.divf %8, %9 : vector<16x64xf32>
    %cst_5 = arith.constant 9.99999993E-9 : f32
    %11 = vector.broadcast %cst_5 : f32 to vector<16x64xf32>
    %12 = arith.addf %10, %11 : vector<16x64xf32>
    %13 = math.sqrt %12 : vector<16x64xf32>
    %14 = vector.shape_cast %13 : vector<16x64xf32> to vector<1x16x64xf32>
    %cst_6 = arith.constant dense<0.000000e+00> : vector<1xf32>
    %15 = vector.multi_reduction <add>, %14, %cst_6 [1, 2] : vector<1x16x64xf32> to vector<1xf32>
    %16 = vector.shape_cast %15 : vector<1xf32> to vector<1x1x1xf32>
    %17 = vector.extract %16[0, 0, 0] : f32 from vector<1x1x1xf32>
    %cst_7 = arith.constant 1.024000e+03 : f32
    %18 = arith.divf %17, %cst_7 : f32
    %19 = vector.broadcast %18 : f32 to vector<1x1xf32>
    %c0_8 = arith.constant 0 : index
    %c0_9 = arith.constant 0 : index
    %20 = vector.load %arg1[%c0_8, %c0_9] : memref<1x1xf32, #tpu.memory_space<vmem>>, vector<1x1xf32>
    tpu.vector_store %arg1[%c0_8, %c0_9], %19 {strides = array<i32>} : memref<1x1xf32, #tpu.memory_space<vmem>>, vector<1x1xf32>,
    return
  }
}

module attributes {stable_mosaic.version = 11 : i64} {
  func.func @_dblock_kernel(%arg0: i32, %arg1: memref<1x1xf32, #tpu.memory_space<smem>>, %arg2: memref<1x16x64xf32, #tpu.memory_space<vmem>>, %arg3: memref<3x90x128xbf16, #tpu.memory_space<vmem>>, %arg4: memref<1x128xf32, #tpu.memory_space<vmem>>, %arg5: memref<3x144x128xbf16, #tpu.memory_space<vmem>>, %arg6: memref<1x128xf32, #tpu.memory_space<vmem>>, %arg7: memref<1x16x128xf32, #tpu.memory_space<vmem>>, %arg8: memref<18x90xf32, #tpu.memory_space<vmem>>, %arg9: memref<18x144xf32, #tpu.memory_space<vmem>>) attributes {dimension_semantics = [#tpu.dimension_semantics<parallel>], iteration_bounds = array<i64: 2>, scalar_prefetch = 0 : i64, scratch_operands = 2 : i64, tpu.core_type = #tpu.core_type<tc>, window_params = [{transform_indices = @transform_0, window_bounds = array<i64: 1, 1>}, {transform_indices = @transform_1, window_bounds = array<i64: 1, 16, 64>}, {pipeline_mode = #tpu.pipeline_mode<synchronous>, transform_indices = @transform_2, window_bounds = array<i64: 3, 90, 128>}, {pipeline_mode = #tpu.pipeline_mode<synchronous>, transform_indices = @transform_3, window_bounds = array<i64: 1, 128>}, {pipeline_mode = #tpu.pipeline_mode<synchronous>, transform_indices = @transform_4, window_bounds = array<i64: 3, 144, 128>}, {pipeline_mode = #tpu.pipeline_mode<synchronous>, transform_indices = @transform_5, window_bounds = array<i64: 1, 128>}, {transform_indices = @transform_6, window_bounds = array<i64: 1, 16, 128>}]} {
    %cst = arith.constant 0.000000e+00 : f32
    %0 = vector.broadcast %cst : f32 to vector<18x90xf32>
    %c0 = arith.constant 0 : index
    %c0_0 = arith.constant 0 : index
    %1 = vector.load %arg8[%c0, %c0_0] : memref<18x90xf32, #tpu.memory_space<vmem>>, vector<18x90xf32>
    tpu.vector_store %arg8[%c0, %c0_0], %0 {strides = array<i32>} : memref<18x90xf32, #tpu.memory_space<vmem>>, vector<18x90xf32>,
    %c0_1 = arith.constant 0 : index
    %c0_2 = arith.constant 0 : index
    %c0_3 = arith.constant 0 : index
    %2 = vector.load %arg2[%c0_1, %c0_2, %c0_3] : memref<1x16x64xf32, #tpu.memory_space<vmem>>, vector<1x16x64xf32>
    %3 = vector.shape_cast %2 : vector<1x16x64xf32> to vector<16x64xf32>
    %c1 = arith.constant 1 : index
    %c4 = arith.constant 4 : index
    %4 = vector.load %arg8[%c1, %c4] : memref<18x90xf32, #tpu.memory_space<vmem>>, vector<16x64xf32>
    tpu.vector_store %arg8[%c1, %c4], %3 {strides = array<i32>} : memref<18x90xf32, #tpu.memory_space<vmem>>, vector<16x64xf32>,
    %c0_4 = arith.constant 0 : index
    %c0_5 = arith.constant 0 : index
    %5 = memref.load %arg1[%c0_4, %c0_5] : memref<1x1xf32, #tpu.memory_space<smem>>
    %6 = vector.broadcast %5 : f32 to vector<16x16xf32>
    %c1_6 = arith.constant 1 : index
    %c73 = arith.constant 73 : index
    %7 = vector.load %arg8[%c1_6, %c73] : memref<18x90xf32, #tpu.memory_space<vmem>>, vector<16x16xf32>
    tpu.vector_store %arg8[%c1_6, %c73], %6 {strides = array<i32>} : memref<18x90xf32, #tpu.memory_space<vmem>>, vector<16x16xf32>,
    %cst_7 = arith.constant 0.000000e+00 : f32
    %8 = vector.broadcast %cst_7 : f32 to vector<16x128xf32>
    %c0_8 = arith.constant 0 : index
    %c0_9 = arith.constant 0 : index
    %9 = vector.load %arg8[%c0_8, %c0_9] : memref<18x90xf32, #tpu.memory_space<vmem>>, vector<16x90xf32>
    %10 = arith.truncf %9 : vector<16x90xf32> to vector<16x90xbf16>
    %c0_10 = arith.constant 0 : index
    %c0_11 = arith.constant 0 : index
    %c0_12 = arith.constant 0 : index
    %11 = vector.load %arg3[%c0_10, %c0_11, %c0_12] : memref<3x90x128xbf16, #tpu.memory_space<vmem>>, vector<1x90x128xbf16>
    %12 = vector.shape_cast %11 : vector<1x90x128xbf16> to vector<90x128xbf16>
    %cst_13 = arith.constant dense<0.000000e+00> : vector<16x128xf32>
    %13 = tpu.matmul %10, %12, %cst_13 {dimension_numbers = #tpu.dot_dimension_numbers<[1], [0], [0], [1], [0, 0, 1, 1], [], []>} : vector<16x90xbf16>, vector<90x128xbf16>, vector<16x128xf32> -> vector<16x128xf32>
    %14 = arith.addf %8, %13 : vector<16x128xf32>
    %c1_14 = arith.constant 1 : index
    %c0_15 = arith.constant 0 : index
    %15 = vector.load %arg8[%c1_14, %c0_15] : memref<18x90xf32, #tpu.memory_space<vmem>>, vector<16x90xf32>
    %16 = arith.truncf %15 : vector<16x90xf32> to vector<16x90xbf16>
    %c1_16 = arith.constant 1 : index
    %c0_17 = arith.constant 0 : index
    %c0_18 = arith.constant 0 : index
    %17 = vector.load %arg3[%c1_16, %c0_17, %c0_18] : memref<3x90x128xbf16, #tpu.memory_space<vmem>>, vector<1x90x128xbf16>
    %18 = vector.shape_cast %17 : vector<1x90x128xbf16> to vector<90x128xbf16>
    %cst_19 = arith.constant dense<0.000000e+00> : vector<16x128xf32>
    %19 = tpu.matmul %16, %18, %cst_19 {dimension_numbers = #tpu.dot_dimension_numbers<[1], [0], [0], [1], [0, 0, 1, 1], [], []>} : vector<16x90xbf16>, vector<90x128xbf16>, vector<16x128xf32> -> vector<16x128xf32>
    %20 = arith.addf %14, %19 : vector<16x128xf32>
    %c2 = arith.constant 2 : index
    %c0_20 = arith.constant 0 : index
    %21 = vector.load %arg8[%c2, %c0_20] : memref<18x90xf32, #tpu.memory_space<vmem>>, vector<16x90xf32>
    %22 = arith.truncf %21 : vector<16x90xf32> to vector<16x90xbf16>
    %c2_21 = arith.constant 2 : index
    %c0_22 = arith.constant 0 : index
    %c0_23 = arith.constant 0 : index
    %23 = vector.load %arg3[%c2_21, %c0_22, %c0_23] : memref<3x90x128xbf16, #tpu.memory_space<vmem>>, vector<1x90x128xbf16>
    %24 = vector.shape_cast %23 : vector<1x90x128xbf16> to vector<90x128xbf16>
    %cst_24 = arith.constant dense<0.000000e+00> : vector<16x128xf32>
    %25 = tpu.matmul %22, %24, %cst_24 {dimension_numbers = #tpu.dot_dimension_numbers<[1], [0], [0], [1], [0, 0, 1, 1], [], []>} : vector<16x90xbf16>, vector<90x128xbf16>, vector<16x128xf32> -> vector<16x128xf32>
    %26 = arith.addf %20, %25 : vector<16x128xf32>
    %c0_25 = arith.constant 0 : index
    %c0_26 = arith.constant 0 : index
    %27 = vector.load %arg4[%c0_25, %c0_26] : memref<1x128xf32, #tpu.memory_space<vmem>>, vector<1x128xf32>
    %28 = vector.broadcast %27 : vector<1x128xf32> to vector<16x128xf32>
    %29 = arith.addf %26, %28 : vector<16x128xf32>
    %cst_27 = arith.constant 0.000000e+00 : f32
    %30 = vector.broadcast %cst_27 : f32 to vector<16x128xf32>
    %31 = arith.cmpf ogt, %29, %30 : vector<16x128xf32>
    %cst_28 = arith.constant 2.000000e-01 : f32
    %32 = vector.broadcast %cst_28 : f32 to vector<16x128xf32>
    %33 = arith.mulf %32, %29 : vector<16x128xf32>
    %34 = arith.select %31, %29, %33 : vector<16x128xi1>, vector<16x128xf32>
    %cst_29 = arith.constant 0.000000e+00 : f32
    %35 = vector.broadcast %cst_29 : f32 to vector<18x144xf32>
    %c0_30 = arith.constant 0 : index
    %c0_31 = arith.constant 0 : index
    %36 = vector.load %arg9[%c0_30, %c0_31] : memref<18x144xf32, #tpu.memory_space<vmem>>, vector<18x144xf32>
    tpu.vector_store %arg9[%c0_30, %c0_31], %35 {strides = array<i32>} : memref<18x144xf32, #tpu.memory_space<vmem>>, vector<18x144xf32>,
    %c1_32 = arith.constant 1 : index
    %c8 = arith.constant 8 : index
    %37 = vector.load %arg9[%c1_32, %c8] : memref<18x144xf32, #tpu.memory_space<vmem>>, vector<16x128xf32>
    tpu.vector_store %arg9[%c1_32, %c8], %34 {strides = array<i32>} : memref<18x144xf32, #tpu.memory_space<vmem>>, vector<16x128xf32>,
    %cst_33 = arith.constant 0.000000e+00 : f32
    %38 = vector.broadcast %cst_33 : f32 to vector<16x128xf32>
    %c0_34 = arith.constant 0 : index
    %c0_35 = arith.constant 0 : index
    %39 = vector.load %arg9[%c0_34, %c0_35] : memref<18x144xf32, #tpu.memory_space<vmem>>, vector<16x144xf32>
    %40 = arith.truncf %39 : vector<16x144xf32> to vector<16x144xbf16>
    %c0_36 = arith.constant 0 : index
    %c0_37 = arith.constant 0 : index
    %c0_38 = arith.constant 0 : index
    %41 = vector.load %arg5[%c0_36, %c0_37, %c0_38] : memref<3x144x128xbf16, #tpu.memory_space<vmem>>, vector<1x144x128xbf16>
    %42 = vector.shape_cast %41 : vector<1x144x128xbf16> to vector<144x128xbf16>
    %cst_39 = arith.constant dense<0.000000e+00> : vector<16x128xf32>
    %43 = tpu.matmul %40, %42, %cst_39 {dimension_numbers = #tpu.dot_dimension_numbers<[1], [0], [0], [1], [0, 0, 1, 1], [], []>} : vector<16x144xbf16>, vector<144x128xbf16>, vector<16x128xf32> -> vector<16x128xf32>
    %44 = arith.addf %38, %43 : vector<16x128xf32>
    %c1_40 = arith.constant 1 : index
    %c0_41 = arith.constant 0 : index
    %45 = vector.load %arg9[%c1_40, %c0_41] : memref<18x144xf32, #tpu.memory_space<vmem>>, vector<16x144xf32>
    %46 = arith.truncf %45 : vector<16x144xf32> to vector<16x144xbf16>
    %c1_42 = arith.constant 1 : index
    %c0_43 = arith.constant 0 : index
    %c0_44 = arith.constant 0 : index
    %47 = vector.load %arg5[%c1_42, %c0_43, %c0_44] : memref<3x144x128xbf16, #tpu.memory_space<vmem>>, vector<1x144x128xbf16>
    %48 = vector.shape_cast %47 : vector<1x144x128xbf16> to vector<144x128xbf16>
    %cst_45 = arith.constant dense<0.000000e+00> : vector<16x128xf32>
    %49 = tpu.matmul %46, %48, %cst_45 {dimension_numbers = #tpu.dot_dimension_numbers<[1], [0], [0], [1], [0, 0, 1, 1], [], []>} : vector<16x144xbf16>, vector<144x128xbf16>, vector<16x128xf32> -> vector<16x128xf32>
    %50 = arith.addf %44, %49 : vector<16x128xf32>
    %c2_46 = arith.constant 2 : index
    %c0_47 = arith.constant 0 : index
    %51 = vector.load %arg9[%c2_46, %c0_47] : memref<18x144xf32, #tpu.memory_space<vmem>>, vector<16x144xf32>
    %52 = arith.truncf %51 : vector<16x144xf32> to vector<16x144xbf16>
    %c2_48 = arith.constant 2 : index
    %c0_49 = arith.constant 0 : index
    %c0_50 = arith.constant 0 : index
    %53 = vector.load %arg5[%c2_48, %c0_49, %c0_50] : memref<3x144x128xbf16, #tpu.memory_space<vmem>>, vector<1x144x128xbf16>
    %54 = vector.shape_cast %53 : vector<1x144x128xbf16> to vector<144x128xbf16>
    %cst_51 = arith.constant dense<0.000000e+00> : vector<16x128xf32>
    %55 = tpu.matmul %52, %54, %cst_51 {dimension_numbers = #tpu.dot_dimension_numbers<[1], [0], [0], [1], [0, 0, 1, 1], [], []>} : vector<16x144xbf16>, vector<144x128xbf16>, vector<16x128xf32> -> vector<16x128xf32>
    %56 = arith.addf %50, %55 : vector<16x128xf32>
    %c0_52 = arith.constant 0 : index
    %c0_53 = arith.constant 0 : index
    %57 = vector.load %arg6[%c0_52, %c0_53] : memref<1x128xf32, #tpu.memory_space<vmem>>, vector<1x128xf32>
    %58 = vector.broadcast %57 : vector<1x128xf32> to vector<16x128xf32>
    %59 = arith.addf %56, %58 : vector<16x128xf32>
    %cst_54 = arith.constant 0.000000e+00 : f32
    %60 = vector.broadcast %cst_54 : f32 to vector<16x128xf32>
    %61 = arith.cmpf ogt, %59, %60 : vector<16x128xf32>
    %cst_55 = arith.constant 2.000000e-01 : f32
    %62 = vector.broadcast %cst_55 : f32 to vector<16x128xf32>
    %63 = arith.mulf %62, %59 : vector<16x128xf32>
    %64 = arith.select %61, %59, %63 : vector<16x128xi1>, vector<16x128xf32>
    %c0_56 = arith.constant 0 : index
    %c0_57 = arith.constant 0 : index
    %c0_58 = arith.constant 0 : index
    %65 = vector.load %arg7[%c0_56, %c0_57, %c0_58] : memref<1x16x128xf32, #tpu.memory_space<vmem>>, vector<1x16x128xf32>
    %66 = vector.shape_cast %65 : vector<1x16x128xf32> to vector<16x128xf32>
    %67 = vector.shape_cast %64 : vector<16x128xf32> to vector<1x16x128xf32>
    tpu.vector_store %arg7[%c0_56, %c0_57, %c0_58], %67 {strides = array<i32>} : memref<1x16x128xf32, #tpu.memory_space<vmem>>, vector<1x16x128xf32>,
    return
  }
  func.func @transform_0(%arg0: i32) -> (i32, i32) {
    %c0_i32 = arith.constant 0 : i32
    %c0_i32_0 = arith.constant 0 : i32
    %c0_i32_1 = arith.constant 0 : i32
    return %c0_i32, %c0_i32_0 : i32, i32
  }
  func.func @transform_1(%arg0: i32) -> (i32, i32, i32) {
    %c0_i32 = arith.constant 0 : i32
    %c0_i32_0 = arith.constant 0 : i32
    %c0_i32_1 = arith.constant 0 : i32
    return %arg0, %c0_i32, %c0_i32_0 : i32, i32, i32
  }
  func.func @transform_2(%arg0: i32) -> (i32, i32, i32) {
    %c0_i32 = arith.constant 0 : i32
    %c0_i32_0 = arith.constant 0 : i32
    %c0_i32_1 = arith.constant 0 : i32
    %c0_i32_2 = arith.constant 0 : i32
    return %c0_i32, %c0_i32_0, %c0_i32_1 : i32, i32, i32
  }
  func.func @transform_3(%arg0: i32) -> (i32, i32) {
    %c0_i32 = arith.constant 0 : i32
    %c0_i32_0 = arith.constant 0 : i32
    %c0_i32_1 = arith.constant 0 : i32
    return %c0_i32, %c0_i32_0 : i32, i32
  }
  func.func @transform_4(%arg0: i32) -> (i32, i32, i32) {
    %c0_i32 = arith.constant 0 : i32
    %c0_i32_0 = arith.constant 0 : i32
    %c0_i32_1 = arith.constant 0 : i32
    %c0_i32_2 = arith.constant 0 : i32
    return %c0_i32, %c0_i32_0, %c0_i32_1 : i32, i32, i32
  }
  func.func @transform_5(%arg0: i32) -> (i32, i32) {
    %c0_i32 = arith.constant 0 : i32
    %c0_i32_0 = arith.constant 0 : i32
    %c0_i32_1 = arith.constant 0 : i32
    return %c0_i32, %c0_i32_0 : i32, i32
  }
  func.func @transform_6(%arg0: i32) -> (i32, i32, i32) {
    %c0_i32 = arith.constant 0 : i32
    %c0_i32_0 = arith.constant 0 : i32
    %c0_i32_1 = arith.constant 0 : i32
    return %arg0, %c0_i32, %c0_i32_0 : i32, i32, i32
  }
}

</mosaic_0001>

<bundles_post_ra>
// kernel: _lambda_.2
= control target key start
LH: loop header
LB: loop body
LE: loop exit
PB: predicated region body
PF: predicated region fallthrough
CT: control target
= control target key end

     0   :  { %vm13_vm0 = vcmask 523264   ;;  %s163_s0 = inlined_call_operand.vmem [shape: f32[2,16,64], index: 0, kind: input, shape index: {}]   ;;  %s164_s1 = inlined_call_operand.hbm [shape: f32[1,1], index: 1, kind: output, shape index: {}]  }
   0x1   :  { %v9_v0 = vld [vmem:[%s163_s0] sm:$0xff]  ;;  %v10_v1 = vld [vmem:[%s163_s0 + $0x8] sm:$0xff]  ;;  %v11_v2 = vld [vmem:[%s163_s0 + $0x10] sm:$0xff] }
   0x2   :  { %v12_v3 = vld [vmem:[%s163_s0 + $0x18] sm:$0xff]  ;;  %v14_v4 = vsel %vm13_vm0, %v9_v0, 0.0  ;;  %v15_v5 = vsel %vm13_vm0, %v11_v2, 0.0  ;;  %v17_v6 = vsel %vm13_vm0, %v10_v1, 0.0 }
   0x3   :  { %6 = vsyncpa [#allocation3], 0  ;;  %v16_v7 = vadd.f32 %v15_v5, %v14_v4  ;;  %v18_v8 = vsel %vm13_vm0, %v12_v3, 0.0  ;;  %s118_s0 = smov [#allocation2]   ;;  %vm71_vm5 = vcmask 0  }
   0x4   :  { %v19_v9 = vadd.f32 %v18_v8, %v17_v6  ;;  %s79_s14 = sshll.u32 %s118_s0, 4  ;;  %s80_s14 = int_to_ptr.vmem [resolvable:$true] %s79_s14 }
   0x5   :  { %v21_v10 = vmul.f32 0.5, %v16_v7  ;;  %s94_s17 = scalar_lea.vmem %s80_s14, 16  ;;  %s98_s18 = scalar_lea.vmem %s80_s14, 32 }
   0x6   :  { %v22_v11 = vmul.f32 0.5, %v19_v9  ;;  %p95_p0 = scmp.ne.s32.totalorder %s80_s14, %s94_s17  ;;  %p99_p1 = scmp.lt.s32.totalorder %s80_s14, %s80_s14 }
   0x7   :  { %v23_v12 = vsub.f32 %v9_v0, %v21_v10  ;;  %v25_v13 = vsub.f32 %v11_v2, %v21_v10  ;;  %p100_p2 = scmp.lt.s32.totalorder %s98_s18, %s94_s17 }
   0x8   :  { %v24_v14 = vsub.f32 %v10_v1, %v22_v11  ;;  %v26_v15 = vsub.f32 %v12_v3, %v22_v11 }
   0x9   :  { %v27_v16 = vmul.f32 %v23_v12, %v23_v12  ;;  %v29_v17 = vmul.f32 %v25_v13, %v25_v13  ;;  %p101_p3 = por %p100_p2, %p99_p1 }
   0xa   :  { %v28_v18 = vmul.f32 %v24_v14, %v24_v14  ;;  %v30_v19 = vmul.f32 %v26_v15, %v26_v15 }
   0xb   :  { %v31_v20 = vsel %vm13_vm0, %v27_v16, 0.0  ;;  %v32_v21 = vsel %vm13_vm0, %v29_v17, 0.0  ;;  %p102_p4 = pnand %p101_p3, %p95_p0 }
   0xc   :  { %v33_v22 = vadd.f32 %v32_v21, %v31_v20  ;;  %v34_v23 = vsel %vm13_vm0, %v28_v18, 0.0  ;;  %v35_v24 = vsel %vm13_vm0, %v30_v19, 0.0 }
   0xd   :  { %v36_v25 = vadd.f32 %v35_v24, %v34_v23 }
   0xe   :  { %v37_v26 = vmul.f32 0.5, %v33_v22 }
   0xf   :  { %v38_v27 = vmul.f32 0.5, %v36_v25 }
  0x10   :  { %v39_v28 = vadd.f32 1e-08, %v37_v26 }
  0x11   :  { %v40_v29 = vadd.f32 1e-08, %v38_v27 }
  0x12   :  { %90 = vrsqrt.f32 %v39_v28  ;;  %vm43_vm1 = vcmp.eq.f32.partialorder %v39_v28, inf  ;;  %v46_v31 = vand.u32 2147483648, %v39_v28  ;;  %vm45_vm2 = vcmp.eq.f32.partialorder %v39_v28, 0.0 }
  0x13   :  { %92 = vrsqrt.f32 %v40_v29  ;;  %vm50_vm3 = vcmp.eq.f32.partialorder %v40_v29, inf  ;;  %v53_v34 = vand.u32 2147483648, %v40_v29  ;;  %vm52_vm4 = vcmp.eq.f32.partialorder %v40_v29, 0.0 }
  0x1c   :  { %v91_v30 = vpop.eup %90 }
  0x1d   :  { %v93_v32 = vpop.eup %92  ;;  %v42_v33 = vmul.f32 %v91_v30, %v39_v28 }
  0x1e   :  { %v49_v35 = vmul.f32 %v93_v32, %v40_v29 }
  0x1f   :  { %v44_v36 = vsel %vm43_vm1, %v39_v28, %v42_v33 }
  0x20   :  { %v47_v37 = vsel %vm45_vm2, %v46_v31, %v44_v36  ;;  %v51_v38 = vsel %vm50_vm3, %v40_v29, %v49_v35 }
  0x21   :  { %v54_v39 = vsel %vm52_vm4, %v53_v34, %v51_v38  ;;  %v55_v40 = vsel %vm13_vm0, %v47_v37, 0.0 }
  0x22   :  { %v56_v41 = vsel %vm13_vm0, %v54_v39, 0.0 }
  0x23   :  { %v57_v42 = vadd.f32 %v56_v41, %v55_v40 }
  0x25   :  { %58 = vadd.xlane.f32.xlu0 %v57_v42 }
  0xb2   :  { %v59_v43 = vpop.xlane.xlu0 %58 }
  0xb3   :  { %v60_v44 = vrot.slane %v59_v43, 4 }
  0xb5   :  { %v61_v45 = vadd.f32 %v60_v44, %v59_v43 }
  0xb7   :  { %v62_v46 = vrot.slane %v61_v45, 2 }
  0xb9   :  { %v63_v47 = vadd.f32 %v62_v46, %v61_v45 }
  0xbb   :  { %v64_v48 = vrot.slane %v63_v47, 1 }
  0xbd   :  { %v65_v49 = vadd.f32 %v64_v48, %v63_v47 }
  0xbf   :  { %87 = vpush %v65_v49 }
  0xf0   :  { %s88_s15 = spop %87 }
  0xf1   :  { %s69_s16 = smul.f32 0.0009765625, %s88_s15 }
  0xf3   :  { %v70_v50 = vstv %s69_s16 }
  0xf4   :  { %72 = vst.msk [vmem:[#allocation2] sm:$0x1] %vm71_vm5, %v70_v50 }
  0xf5   :  { %105 = shalt.err (!%p102_p4)
}
  0xf6   :  { %s106_s21 = scalar_lea.hbm %s164_s1, 16 }
  0xf7   :  { %p107_p5 = scmp.ne.s32.totalorder %s164_s1, %s106_s21  ;;  %p110_p6 = scmp.lt.u32.totalorder %s106_s21, %s164_s1 }
  0xf9   :  { %p112_p7 = pnand %p110_p6, %p107_p5 }
  0xfb   :  { %115 = shalt.err (!%p112_p7)
}
  0xfc   :  { %82 = dma.vmem_to_hbm [thread:$0]  %s80_s14, 16, %s164_s1, [#allocation3]  }
  0xfd   :  { %116 = dma.done.wait [#allocation3], 16  }
  0xfe   :  { %117 = vsyncadd [#allocation3], 4294967280 }
  0xff   :  { %86 = vsyncpa [#allocation3], 1 }

// kernel: _lambda_.3
= control target key start
LH: loop header
LB: loop body
LE: loop exit
PB: predicated region body
PF: predicated region fallthrough
CT: control target
= control target key end

     0   :  { %s1411_s23 = smov 0   ;;  %s1656_s0 = inlined_call_operand.<no memory space> [shape: f32[1,1], index: 0, kind: input, shape index: {}]   ;;  %s1657_s1 = inlined_call_operand.vmem [shape: f32[2,16,64], index: 1, kind: input, shape index: {}]   ;;  %s1658_s2 = inlined_call_operand.vmem [shape: bf16[3,90,128], index: 2, kind: input, shape index: {}]   ;;  %s1659_s3 = inlined_call_operand.vmem [shape: f32[1,128], index: 3, kind: input, shape index: {}, may-alias: {3,5}]   ;;  %s1660_s4 = inlined_call_operand.vmem [shape: bf16[3,144,128], index: 4, kind: input, shape index: {}]   ;;  %s1661_s5 = inlined_call_operand.vmem [shape: f32[1,128], index: 5, kind: input, shape index: {}, may-alias: {3,5}]   ;;  %s1662_s6 = inlined_call_operand.vmem [shape: f32[2,16,128], index: 6, kind: output, shape index: {}]  }
   0x1   :  { %11 = sst [smem:[#allocation4]] %s1656_s0 }
   0x2 LB: > { %s1107_s24 = sadd.s32 4294967295, %s1366_s23   ;;  %p1111_p0 = scmp.ge.s32.totalorder %s1366_s23, 1  ;;  %s1366_s23 = sphi %s1411_s23, %s17_s23  }
   0x3   : > { %p213_p1 = scmp.lt.s32.totalorder %s1366_s23, 3 }
   0x5   : > { %p214_p2 = pnand %p1111_p0, %p213_p1 }
   0x6   : > { %p243_p3 = scmp.lt.s32.totalorder (!%p214_p2), %s1107_s24, 1  ;;  %v1315_v0 = vld [vmem:[%s1658_s2 + $0x30] sm:$0xff] (!%p214_p2)   ;;  %v1368_v1 = vmov (!%p214_p2), 0.0   ;;  %v1316_v2 = vld [vmem:[%s1658_s2] sm:$0xff] (!%p214_p2)   ;;  %v1317_v3 = vld [vmem:[%s1658_s2 + $0x38] sm:$0xff] (!%p214_p2)   ;;  %vm254_vm0 = vcmask (!%p214_p2), 736256  }
   0x7   : > { %217 = sbr.rel (%p214_p2) target bundleno = 789 (0x315), region = 44  ;;  %1254 = vmatprep.subr.bf16.mxu0 (!%p214_p2), %v1368_v1  ;;  %588 = vst [vmem:[#allocation3] sm:$0xff] (!%p214_p2), %v1368_v1  ;;  %591 = vst [vmem:[#allocation3 + $0x10] sm:$0xff] (!%p214_p2), %v1368_v1  ;;  %1270 = vmatprep.subr.bf16.mxu1 (!%p214_p2), %v1368_v1  ;;  %v1318_v4 = vld [vmem:[%s1658_s2 + $0x8] sm:$0xff] (!%p214_p2)   ;;  %v1319_v6 = vld [vmem:[%s1658_s2 + $0x40] sm:$0xff] (!%p214_p2)   ;;  %s1369_s14 = smov (!%p214_p2), 4  }
   0x8   : > { %593 = vst [vmem:[#allocation3 + $0x20] sm:$0x3] (!%p214_p2), %v1368_v1  ;;  %1255 = vmatpush3.bf16.msra.mxu0 (!%p214_p2), %v1315_v0  ;;  %1271 = vmatpush3.bf16.msra.mxu1 (!%p214_p2), %v1316_v2  ;;  %255 = vst.msk [vmem:[#allocation2] sm:$0xff] (!%p214_p2), %vm254_vm0, %v1368_v1  ;;  %v1320_v7 = vld [vmem:[%s1658_s2 + $0x10] sm:$0xff] (!%p214_p2)   ;;  %vm257_vm1 = vcmask (!%p214_p2), 730112   ;;  %v1321_v9 = vld [vmem:[%s1658_s2 + $0x48] sm:$0xff] (!%p214_p2)  }
   0x9   : > { %1256 = vmatprep.subr.bf16.mxu0 (!%p214_p2), %v1368_v1  ;;  %256 = vst.msk [vmem:[#allocation2 + $0x8] sm:$0xff] (!%p214_p2), %vm254_vm0, %v1368_v1  ;;  %1272 = vmatprep.subr.bf16.mxu1 (!%p214_p2), %v1368_v1  ;;  %vm1370_vm2 = vmmov (!%p214_p2), 0   ;;  %v1322_v10 = vld [vmem:[%s1658_s2 + $0x18] sm:$0xff] (!%p214_p2)   ;;  %v1323_v11 = vld [vmem:[%s1658_s2 + $0x50] sm:$0xff] (!%p214_p2)   ;;  %vm346_vm3 = vcmask (!%p214_p2), 1044480   ;;  %v1324_v12 = vld [vmem:[%s1658_s2 + $0x20] sm:$0xff] (!%p214_p2)  }
   0xa   : > { %258 = vst.msk [vmem:[#allocation2 + $0x10] sm:$0x3] (!%p214_p2), %vm257_vm1, %v1368_v1  ;;  %1266 = vmatprep.mubr.msk.bf16.mxu0 (!%p214_p2), %vm1370_vm2, %v1368_v1  ;;  %1282 = vmatprep.mubr.msk.bf16.mxu1 (!%p214_p2), %vm1370_vm2, %v1368_v1  ;;  %v1325_v13 = vld [vmem:[%s1658_s2 + $0x58] sm:$0x1f] (!%p214_p2)   ;;  %v1326_v14 = vld [vmem:[%s1658_s2 + $0x28] sm:$0x1f] (!%p214_p2)  }
   0xb   : > { %v348_v15 = vsel (!%p214_p2), %vm346_vm3, %v1325_v13, 0  ;;  %v430_v16 = vsel (!%p214_p2), %vm346_vm3, %v1326_v14, 0  ;;  %s272_s7 = sld [smem:[#allocation4]] (!%p214_p2)  ;;  %vm269_vm4 = vcmask (!%p214_p2), 556064   ;;  %vm274_vm5 = vcmask (!%p214_p2), 728648   ;;  %v1327_v24 = vld [vmem:[%s1658_s2 + $0x60] sm:$0xff] (!%p214_p2)  }
   0xc   : > { %1257 = vmatpush3.bf16.msra.mxu0 (!%p214_p2), %v1317_v3  ;;  %1273 = vmatpush3.bf16.msra.mxu1 (!%p214_p2), %v1318_v4  ;;  %v1328_v27 = vld [vmem:[%s1658_s2 + $0x68] sm:$0xff] (!%p214_p2)   ;;  %v1329_v28 = vld [vmem:[%s1658_s2 + $0x70] sm:$0xff] (!%p214_p2)   ;;  %v1330_v29 = vld [vmem:[%s1658_s2 + $0x78] sm:$0xff] (!%p214_p2)   ;;  %vm589_vm6 = vcmask (!%p214_p2), 130048   ;;  %v1371_v38 = vmov (!%p214_p2), 0   ;;  %vm594_vm7 = vcmask (!%p214_p2), 123904  }
   0xd   : > { %1258 = vmatprep.subr.bf16.mxu0 (!%p214_p2), %v1368_v1  ;;  %1274 = vmatprep.subr.bf16.mxu1 (!%p214_p2), %v1368_v1  ;;  %v1331_v30 = vld [vmem:[%s1658_s2 + $0x80] sm:$0xff] (!%p214_p2)   ;;  %v1332_v31 = vld [vmem:[%s1658_s2 + $0x88] sm:$0x1f] (!%p214_p2)   ;;  %590 = vst.msk [vmem:[#allocation3 + $0x8] sm:$0xff] (!%p214_p2), %vm589_vm6, %v1368_v1  ;;  %592 = vst.msk [vmem:[#allocation3 + $0x18] sm:$0xff] (!%p214_p2), %vm589_vm6, %v1368_v1  ;;  %vm598_vm10 = vcmask (!%p214_p2), 1040384  }
   0xe   : > { %s1664_s24 = smov (!%p243_p3, %s1107_s24), 1  ;;  %v528_v34 = vsel %vm346_vm3, %v1332_v31, 0  ;;  %v1333_v36 = vld [vmem:[%s1660_s4] sm:$0xff]   ;;  %v1335_v37 = vld [vmem:[%s1660_s4 + $0x48] sm:$0xff]   ;;  %v1337_v40 = vld [vmem:[%s1660_s4 + $0x50] sm:$0xff]   ;;  %s1372_s12 = smov 8  }
   0xf   : > { %s1231_s30 = sshll.u32 %s1664_s24, 4  ;;  %v1334_v39 = vld [vmem:[%s1660_s4 + $0x8] sm:$0xff]   ;;  %v1336_v41 = vld [vmem:[%s1660_s4 + $0x10] sm:$0xff]   ;;  %v1339_v42 = vld [vmem:[%s1660_s4 + $0x58] sm:$0xff]   ;;  %595 = vst.msk [vmem:[#allocation3 + $0x28] sm:$0x3] %vm594_vm7, %v1368_v1 }
  0x10   : > { %s247_s11 = scalar_lea.vmem %s1657_s1, %s1231_s30  ;;  %1259 = vmatpush3.bf16.msra.mxu0 %v1319_v6  ;;  %1275 = vmatpush3.bf16.msra.mxu1 %v1320_v7  ;;  %v1338_v43 = vld [vmem:[%s1660_s4 + $0x18] sm:$0xff]   ;;  %v1341_v44 = vld [vmem:[%s1660_s4 + $0x60] sm:$0xff]   ;;  %v1342_v56 = vld [vmem:[%s1660_s4 + $0x28] sm:$0xff]   ;;  %vm611_vm11 = vcmask 1047617   ;;  %vm613_vm12 = vcmask 64513   ;;  %vm619_vm13 = vcmask 1040448   ;;  %s252_s15 = scalar_lea.vmem %s1662_s6, %s1231_s30 }
  0x11   : > { %v259_v5 = vld [vmem:[%s247_s11] sm:$0xff]  ;;  %v260_v8 = vld [vmem:[%s247_s11 + $0x8] sm:$0xff]  ;;  %1260 = vmatprep.subr.bf16.mxu0 %v1368_v1  ;;  %1276 = vmatprep.subr.bf16.mxu1 %v1368_v1  ;;  %v273_v17 = vstv %s272_s7  ;;  %v1344_v58 = vld [vmem:[%s1660_s4 + $0x30] sm:$0xff]   ;;  %vm621_vm14 = vcmask 57344   ;;  %vm615_vm15 = vcmask 1047616  }
  0x12   : > { %263 = vrot.lane.b32.xlu0 %v259_v5, %s1369_s14  ;;  %v1340_v45 = vld [vmem:[%s1660_s4 + $0x20] sm:$0xff]   ;;  %v1343_v57 = vld [vmem:[%s1660_s4 + $0x68] sm:$0xff]   ;;  %v1345_v63 = vld [vmem:[%s1660_s4 + $0x70] sm:$0xff]   ;;  %vm674_vm1 = vsmask.f32 7424 }
  0x13   : > { %v1161_v60 = vld [vmem:[%s1659_s3] ss:$0 sm:$0xff]  ;;  %v1346_v0 = vld [vmem:[%s1660_s4 + $0x38] sm:$0xff]  }
  0x14   : > { %1261 = vmatpush3.bf16.msra.mxu0 %v1321_v9  ;;  %1277 = vmatpush3.bf16.msra.mxu1 %v1322_v10  ;;  %v1347_v5 = vld [vmem:[%s1660_s4 + $0x78] sm:$0xff]  }
  0x15   : > { %1262 = vmatprep.subr.bf16.mxu0 %v1368_v1  ;;  %1278 = vmatprep.subr.bf16.mxu1 %v1368_v1 }
  0x16   : > { %265 = vrot.lane.b32.xlu0 %v260_v8, %s1369_s14  ;;  %v1348_v8 = vld [vmem:[%s1660_s4 + $0x40] sm:$0xff]  }
  0x18   : > { %1263 = vmatpush3.bf16.msra.mxu0 %v1323_v11  ;;  %1279 = vmatpush3.bf16.msra.mxu1 %v1324_v12  ;;  %v1349_v11 = vld [vmem:[%s1660_s4 + $0x80] sm:$0xff]  }
  0x19   : > { %1264 = vmatprep.subr.bf16.mxu0 %v1368_v1  ;;  %1280 = vmatprep.subr.bf16.mxu1 %v1368_v1 }
  0x1c   : > { %1265 = vmatpush3.bf16.msra.mxu0 %v348_v15  ;;  %1281 = vmatpush3.bf16.msra.mxu1 %v430_v16  ;;  %v1350_v16 = vld [vmem:[%s1660_s4 + $0x88] sm:$0xff]  }
  0x1d   : > { %1286 = vmatprep.subr.bf16.mxu0 %v1368_v1  ;;  %757 = vmatprep.subr.bf16.mxu1 %v1371_v38 }
  0x84   : > { %v264_v18 = vpop.permute.xlu0 %263 }
  0x85   : > { %270 = vst.msk [vmem:[#allocation2 + $0x1] sm:$0xff] %vm269_vm4, %v264_v18 }
  0x86   : > { %275 = vst.msk [vmem:[#allocation2 + $0x1] sm:$0xff] %vm274_vm5, %v273_v17 }
  0x88   : > { %v266_v19 = vpop.permute.xlu0 %265 }
  0x89   : > { %271 = vst.msk [vmem:[#allocation2 + $0x9] sm:$0xff] %vm269_vm4, %v266_v19 }
  0x8a   : > { %276 = vst.msk [vmem:[#allocation2 + $0x9] sm:$0xff] %vm274_vm5, %v273_v17 }
  0x8d   : > { %v292_v20 = vld [vmem:[#allocation2 + $0x1] sm:$0xff] }
  0x8e   : > { %v277_v21 = vld [vmem:[#allocation2] sm:$0xff] }
  0x91   : > { %v293_v22 = vld [vmem:[#allocation2 + $0x9] sm:$0xff] }
  0x92   : > { %v278_v23 = vld [vmem:[#allocation2 + $0x8] sm:$0xff]  ;;  %v294_v25 = vpack.c.bf16 %v293_v22, %v292_v20 }
  0x93   : > { %v279_v26 = vpack.c.bf16 %v278_v23, %v277_v21  ;;  %v473_v32 = vld [vmem:[#allocation2 + $0x2] sm:$0xff]  ;;  %v474_v33 = vld [vmem:[#allocation2 + $0xa] sm:$0xff] }
  0x94   : > { %1267 = vmatmul.mubr.msk.bf16.vlgmr.msra.gmra.mrb[0].mxu0 %vm254_vm0, %v294_v25  ;;  %v475_v35 = vpack.c.bf16 %v474_v33, %v473_v32 }
  0x95   : > { %1283 = vmatmul.mubr.msk.bf16.vlgmr.msra.gmra.mrb[0].mxu1 %vm254_vm0, %v279_v26  ;;  %1287 = vmatpush3.bf16.msra.mxu0 %v1327_v24 }
  0x96   : > { %1298 = vmatprep.mubr.msk.bf16.mxu0 %vm1370_vm2, %v1368_v1  ;;  %1288 = vmatprep.subr.bf16.mxu0 %v1368_v1  ;;  %vm927_vm2 = vcmask 1046528  }
  0x97   : > { %758 = vmatpush1.bf16.msra.mxu1 %v1335_v37 }
  0x98   : > { %759 = vmatprep.subr.bf16.mxu1 %v1371_v38 }
  0x99   : > { %1289 = vmatpush3.bf16.msra.mxu0 %v1328_v27 }
  0x9a   : > { %1290 = vmatprep.subr.bf16.mxu0 %v1368_v1 }
  0x9b   : > { %760 = vmatpush1.bf16.msra.mxu1 %v1337_v40 }
  0x9c   : > { %761 = vmatprep.subr.bf16.mxu1 %v1371_v38 }
  0x9d   : > { %1291 = vmatpush3.bf16.msra.mxu0 %v1329_v28 }
  0x9e   : > { %1292 = vmatprep.subr.bf16.mxu0 %v1368_v1 }
  0x9f   : > { %762 = vmatpush1.bf16.msra.mxu1 %v1339_v42 }
  0xa0   : > { %763 = vmatprep.subr.bf16.mxu1 %v1371_v38 }
  0xa1   : > { %1293 = vmatpush3.bf16.msra.mxu0 %v1330_v29 }
  0xa2   : > { %1294 = vmatprep.subr.bf16.mxu0 %v1368_v1 }
  0xa3   : > { %764 = vmatpush1.bf16.msra.mxu1 %v1341_v44 }
  0xa4   : > { %765 = vmatprep.subr.bf16.mxu1 %v1371_v38 }
  0xa5   : > { %1295 = vmatpush3.bf16.msra.mxu0 %v1331_v30 }
  0xa6   : > { %1296 = vmatprep.subr.bf16.mxu0 %v1368_v1 }
  0xa7   : > { %766 = vmatpush1.bf16.msra.mxu1 %v1343_v57  ;;  %v1352_v57 = vld [vmem:[%s1660_s4 + $0x98] sm:$0xff]  }
  0xa8   : > { %767 = vmatprep.subr.bf16.mxu1 %v1371_v38 }
  0xa9   : > { %1297 = vmatpush3.bf16.msra.mxu0 %v528_v34 }
  0xaa   : > { %855 = vmatprep.subr.bf16.mxu0 %v1371_v38 }
  0xab   : > { %768 = vmatpush1.bf16.msra.mxu1 %v1345_v63  ;;  %v1358_v63 = vld [vmem:[%s1660_s4 + $0xc8] sm:$0xff]  }
  0xac   : > { %1299 = vmatmul.mubr.msk.bf16.vlgmr.msra.gmra.mrb[4].mxu0 %vm254_vm0, %v475_v35  ;;  %769 = vmatprep.subr.bf16.mxu1 %v1371_v38  ;;  %vm617_vm0 = vcmask 64512  }
  0xad   : > { %856 = vmatpush1.bf16.msra.mxu0 %v1333_v36 }
  0xae   : > { %857 = vmatprep.subr.bf16.mxu0 %v1371_v38 }
  0xaf   : > { %770 = vmatpush1.bf16.msra.mxu1 %v1347_v5 }
  0xb0   : > { %771 = vmatprep.subr.bf16.mxu1 %v1371_v38 }
  0xb1   : > { %858 = vmatpush1.bf16.msra.mxu0 %v1334_v39 }
  0xb2   : > { %859 = vmatprep.subr.bf16.mxu0 %v1371_v38 }
  0xb3   : > { %772 = vmatpush1.bf16.msra.mxu1 %v1349_v11 }
  0xb4   : > { %773 = vmatprep.subr.bf16.mxu1 %v1371_v38 }
  0xb5   : > { %860 = vmatpush1.bf16.msra.mxu0 %v1336_v41 }
  0xb6   : > { %861 = vmatprep.subr.bf16.mxu0 %v1371_v38 }
  0xb7   : > { %774 = vmatpush1.bf16.msra.mxu1 %v1350_v16 }
  0xb8   : > { %992 = vmatprep.subr.bf16.mxu1 %v1371_v38 }
  0xb9   : > { %862 = vmatpush1.bf16.msra.mxu0 %v1338_v43 }
  0xba   : > { %863 = vmatprep.subr.bf16.mxu0 %v1371_v38 }
  0xbd   : > { %864 = vmatpush1.bf16.msra.mxu0 %v1340_v45 }
  0xbe   : > { %865 = vmatprep.subr.bf16.mxu0 %v1371_v38 }
  0xc1   : > { %866 = vmatpush1.bf16.msra.mxu0 %v1342_v56 }
  0xc2   : > { %867 = vmatprep.subr.bf16.mxu0 %v1371_v38 }
  0xc5   : > { %868 = vmatpush1.bf16.msra.mxu0 %v1344_v58  ;;  %v1353_v58 = vld [vmem:[%s1660_s4 + $0xa0] sm:$0xff]  }
  0xc6   : > { %869 = vmatprep.subr.bf16.mxu0 %v1371_v38 }
  0xc9   : > { %870 = vmatpush1.bf16.msra.mxu0 %v1346_v0 }
  0xca   : > { %871 = vmatprep.subr.bf16.mxu0 %v1371_v38 }
  0xcd   : > { %872 = vmatpush1.bf16.msra.mxu0 %v1348_v8 }
 0x167   : > { %v384_v46 = vpop.f32.mrb[0].mxu0 }
 0x168   : > { %v466_v47 = vpop.f32.mrb[0].mxu1  ;;  %v1268_v49 = vpop.f32.mrb[1].mxu0 }
 0x169   : > { %v467_v48 = vadd.f32 %v466_v47, %v384_v46  ;;  %v1284_v50 = vpop.f32.mrb[1].mxu1  ;;  %v387_v51 = vpop.f32.mrb[2].mxu0 }
 0x16a   : > { %v469_v52 = vpop.f32.mrb[2].mxu1  ;;  %v1269_v54 = vpop.f32.mrb[3].mxu0 }
 0x16b   : > { %v470_v53 = vadd.f32 %v469_v52, %v387_v51  ;;  %v1285_v55 = vpop.f32.mrb[3].mxu1  ;;  %v1351_v52 = vld [vmem:[%s1660_s4 + $0x90] sm:$0xff]  }
 0x17f   : > { %v564_v59 = vpop.f32.mrb[4].mxu0 }
 0x180   : > { %v571_v61 = vadd.f32 %v564_v59, %v467_v48  ;;  %v1300_v62 = vpop.f32.mrb[5].mxu0  ;;  %v1354_v59 = vld [vmem:[%s1660_s4 + $0xa8] sm:$0xff]  }
 0x181   : > { %v567_v1 = vpop.f32.mrb[6].mxu0  ;;  %v1357_v62 = vld [vmem:[%s1660_s4 + $0xc0] sm:$0xff]  }
 0x182   : > { %v580_v2 = vadd.f32 %v1161_v60, %v571_v61  ;;  %v572_v3 = vadd.f32 %v567_v1, %v470_v53  ;;  %v1301_v4 = vpop.f32.mrb[7].mxu0  ;;  %v1356_v61 = vld [vmem:[%s1660_s4 + $0xb8] sm:$0xff]  }
 0x184   : > { %v581_v6 = vadd.f32 %v1161_v60, %v572_v3  ;;  %vm582_vm8 = vcmp.gt.f32.partialorder %v580_v2, 0.0  ;;  %v584_v7 = vmul.f32 0.2, %v580_v2  ;;  %v1355_v60 = vld [vmem:[%s1660_s4 + $0xb0] sm:$0xff]  }
 0x185   : > { %v1359_v3 = vld [vmem:[%s1660_s4 + $0xd0] sm:$0xff]  }
 0x186   : > { %v585_v9 = vmul.f32 0.2, %v581_v6  ;;  %v586_v10 = vsel %vm582_vm8, %v580_v2, %v584_v7  ;;  %vm583_vm9 = vcmp.gt.f32.partialorder %v581_v6, 0.0 }
 0x187   : > { %v599_v12 = vrot.slane %v586_v10, 7 }
 0x188   : > { %v587_v13 = vsel %vm583_vm9, %v581_v6, %v585_v9 }
 0x189   : > { %602 = vrot.lane.b32.xlu1 %v599_v12, %s1372_s12  ;;  %v600_v14 = vrot.slane %v587_v13, 7 }
 0x18b   : > { %606 = vrot.lane.b32.xlu0 %v600_v14, %s1372_s12  ;;  %v601_v15 = vsel %vm598_vm10, %v599_v12, %v600_v14 }
 0x18d   : > { %604 = vrot.lane.b32.xlu1 %v601_v15, %s1372_s12 }
 0x1fb   : > { %v603_v17 = vpop.permute.xlu1 %602 }
 0x1fc   : > { %612 = vst.msk [vmem:[#allocation3] sm:$0xfe] %vm611_vm11, %v603_v17 }
 0x1fd   : > { %614 = vst.msk [vmem:[#allocation3 + $0x8] sm:$0xfe] %vm613_vm12, %v603_v17  ;;  %v607_v18 = vpop.permute.xlu0 %606 }
 0x1fe   : > { %620 = vst.msk [vmem:[#allocation3 + $0x20] sm:$0x1] %vm619_vm13, %v607_v18 }
 0x1ff   : > { %622 = vst.msk [vmem:[#allocation3 + $0x28] sm:$0x1] %vm621_vm14, %v607_v18  ;;  %v605_v19 = vpop.permute.xlu1 %604 }
 0x200   : > { %616 = vst.msk [vmem:[#allocation3 + $0x10] sm:$0xff] %vm615_vm15, %v605_v19 }
 0x201   : > { %618 = vst.msk [vmem:[#allocation3 + $0x18] sm:$0xff] %vm617_vm0, %v605_v19 }
 0x203   : > { %v623_v23 = vld [vmem:[#allocation3] sm:$0xff] }
 0x204   : > { %v624_v22 = vld [vmem:[#allocation3 + $0x8] sm:$0xff]  ;;  %v647_v32 = vld [vmem:[#allocation3] sm:$0xfe] }
 0x205   : > { %v649_v21 = vld [vmem:[#allocation3 + $0x20] sm:$0x1]  ;;  %v648_v27 = vld [vmem:[#allocation3 + $0x8] sm:$0xfe]  ;;  %v896_v0 = vld [vmem:[#allocation3] sm:$0xfc] }
 0x206   : > { %v650_v20 = vld [vmem:[#allocation3 + $0x28] sm:$0x1]  ;;  %v653_v28 = vpack.c.bf16 %v649_v21, %v649_v21  ;;  %v897_v34 = vld [vmem:[#allocation3 + $0x8] sm:$0xfc]  ;;  %v898_v1 = vld [vmem:[#allocation3 + $0x20] sm:$0x3] }
 0x207   : > { %v654_v24 = vpack.c.bf16 %v650_v20, %v650_v20  ;;  %v1600_v26 = vld [vmem:[#allocation3 + $0x10] sm:$0xff]  ;;  %v899_v35 = vld [vmem:[#allocation3 + $0x28] sm:$0x3]  ;;  %v902_v4 = vpack.c.bf16 %v898_v1, %v898_v1 }
 0x208   : > { %v626_v25 = vld [vmem:[#allocation3 + $0x18] sm:$0xff]  ;;  %v627_v30 = vpack.c.bf16 %v1600_v26, %v623_v23  ;;  %v651_v33 = vpack.c.bf16 %v1600_v26, %v647_v32  ;;  %v683_v41 = vshll.u32 %v653_v28, 16  ;;  %v903_v44 = vpack.c.bf16 %v899_v35, %v899_v35 }
 0x209   : > { %v628_v29 = vpack.c.bf16 %v626_v25, %v624_v22  ;;  %v652_v31 = vpack.c.bf16 %v626_v25, %v648_v27  ;;  %v695_v37 = vshll.u32 %v654_v24, 16  ;;  %v901_v39 = vpack.c.bf16 %v626_v25, %v897_v34 }
 0x20a   : > { %v678_v40 = vshll.u32 %v651_v33, 16  ;;  %v676_v45 = vshrl.u32 %v651_v33, 16  ;;  %v685_v51 = vrot.slane %v683_v41, 1  ;;  %v932_v54 = vrot.slane %v903_v44, 1 }
 0x20b   : > { %1199 = vmatprep.mubr.msk.bf16.mxu0 %vm589_vm6, %v628_v29  ;;  %v690_v36 = vshll.u32 %v652_v31, 16  ;;  %v688_v42 = vshrl.u32 %v652_v31, 16  ;;  %v697_v48 = vrot.slane %v695_v37, 1  ;;  %v931_v49 = vrot.slane %v901_v39, 1 }
 0x20c   : > { %888 = vmatmul.mubr.bf16.vlgmr.msra.gmra.mrb[8].mxu0 %v627_v30  ;;  %v680_v46 = vrot.slane %v678_v40, 1  ;;  %v900_v2 = vpack.c.bf16 %v1600_v26, %v896_v0  ;;  %v929_v6 = vrot.slane %v902_v4, 1 }
 0x20d   : > { %v692_v43 = vrot.slane %v690_v36, 1  ;;  %v933_v56 = vsel %vm927_vm2, %v931_v49, %v932_v54 }
 0x20e   : > { %v681_v50 = vor.u32 %v680_v46, %v676_v45  ;;  %v928_v5 = vrot.slane %v900_v2, 1 }
 0x20f   : > { %v693_v47 = vor.u32 %v692_v43, %v688_v42 }
 0x210   : > { %v686_v55 = vsel %vm674_vm1, %v681_v50, %v685_v51  ;;  %v930_v7 = vsel %vm927_vm2, %v928_v5, %v929_v6 }
 0x211   : > { %v698_v53 = vsel %vm674_vm1, %v693_v47, %v697_v48 }
 0x212   : > { %1189 = vmatprep.mubr.msk.bf16.mxu1 %vm589_vm6, %v698_v53 }
 0x213   : > { %790 = vmatmul.mubr.bf16.vlgmr.msra.gmra.mrb[4].mxu1 %v686_v55 }
 0x214   : > { %993 = vmatpush1.bf16.msra.mxu1 %v1351_v52  ;;  %1227 = vmatprep.mubr.msk.bf16.mxu1 %vm589_vm6, %v933_v56 }
 0x215   : > { %994 = vmatprep.subr.bf16.mxu1 %v1371_v38 }
 0x218   : > { %995 = vmatpush1.bf16.msra.mxu1 %v1352_v57 }
 0x219   : > { %996 = vmatprep.subr.bf16.mxu1 %v1371_v38 }
 0x21c   : > { %997 = vmatpush1.bf16.msra.mxu1 %v1353_v58 }
 0x21d   : > { %998 = vmatprep.subr.bf16.mxu1 %v1371_v38 }
 0x220   : > { %999 = vmatpush1.bf16.msra.mxu1 %v1354_v59 }
 0x221   : > { %1000 = vmatprep.subr.bf16.mxu1 %v1371_v38 }
 0x224   : > { %1001 = vmatpush1.bf16.msra.mxu1 %v1355_v60 }
 0x225   : > { %1002 = vmatprep.subr.bf16.mxu1 %v1371_v38 }
 0x228   : > { %1003 = vmatpush1.bf16.msra.mxu1 %v1356_v61 }
 0x229   : > { %1004 = vmatprep.subr.bf16.mxu1 %v1371_v38 }
 0x22c   : > { %1005 = vmatpush1.bf16.msra.mxu1 %v1357_v62 }
 0x22d   : > { %1006 = vmatprep.subr.bf16.mxu1 %v1371_v38 }
 0x230   : > { %1007 = vmatpush1.bf16.msra.mxu1 %v1358_v63 }
 0x231   : > { %1008 = vmatprep.subr.bf16.mxu1 %v1371_v38  ;;  %v1228_v38 = vld [vmem:[%s1661_s5] ss:$0 sm:$0xff] }
 0x234   : > { %1009 = vmatpush1.bf16.msra.mxu1 %v1359_v3 }
 0x237   : > { %1025 = vmatmul.mubr.bf16.vlgmr.msra.gmra.mrb[8].mxu1 %v930_v7 }
 0x2df   : > { %v889_v8 = vpop.f32.mrb[8].mxu0 }
 0x2e0   : > { %v891_v9 = vpop.f32.mrb[9].mxu0 }
 0x2e1   : > { %v892_v10 = vpop.f32.mrb[10].mxu0 }
 0x2e2   : > { %v894_v11 = vpop.f32.mrb[11].mxu0 }
 0x2e6   : > { %v791_v12 = vpop.f32.mrb[4].mxu1 }
 0x2e7   : > { %v890_v13 = vadd.f32 %v889_v8, %v791_v12  ;;  %v793_v14 = vpop.f32.mrb[5].mxu1 }
 0x2e8   : > { %v794_v15 = vpop.f32.mrb[6].mxu1 }
 0x2e9   : > { %v893_v16 = vadd.f32 %v892_v10, %v794_v15  ;;  %v796_v17 = vpop.f32.mrb[7].mxu1 }
 0x30a   : > { %v1026_v18 = vpop.f32.mrb[8].mxu1 }
 0x30b   : > { %v1033_v19 = vadd.f32 %v1026_v18, %v890_v13  ;;  %v1028_v20 = vpop.f32.mrb[9].mxu1 }
 0x30c   : > { %v1029_v21 = vpop.f32.mrb[10].mxu1 }
 0x30d   : > { %v1042_v22 = vadd.f32 %v1228_v38, %v1033_v19  ;;  %v1034_v23 = vadd.f32 %v1029_v21, %v893_v16  ;;  %v1031_v24 = vpop.f32.mrb[11].mxu1 }
 0x30f   : > { %vm1044_vm3 = vcmp.gt.f32.partialorder %v1042_v22, 0.0  ;;  %v1046_v25 = vmul.f32 0.2, %v1042_v22  ;;  %v1043_v26 = vadd.f32 %v1228_v38, %v1034_v23 }
 0x311   : > { %v1048_v27 = vsel %vm1044_vm3, %v1042_v22, %v1046_v25  ;;  %vm1045_vm4 = vcmp.gt.f32.partialorder %v1043_v26, 0.0  ;;  %v1047_v28 = vmul.f32 0.2, %v1043_v26 }
 0x312   : > { %1050 = vst [vmem:[%s252_s15] sm:$0xff] %v1048_v27 }
 0x313   : > { %v1049_v29 = vsel %vm1045_vm4, %v1043_v26, %v1047_v28 }
 0x314   : > { %1051 = vst [vmem:[%s252_s15 + $0x8] sm:$0xff] %v1049_v29 }
 0x315 PF: > { %s17_s23 = sadd.s32 1, %s1366_s23  }
 0x316   : > { %p14_p4 = scmp.ge.s32.totalorder %s17_s23, 4  }
 0x318   :  { %16 = sbr.rel (!%p14_p4) target bundleno = 2 (0x2), region = 78 }

</bundles_post_ra>
